<compile_context>
chip_gen: v6e
topology: v6e:2x2x1
jax: 0.10.0
libtpu: 0.0.40
codegen_flags: <defaults>
</compile_context>

<pallas_src>
import functools

import jax
import jax.numpy as jnp
import numpy as np
from jax.experimental import pallas as pl
from jax.experimental.pallas import tpu as pltpu


def _bce_dice_kernel(x_ref, t_ref, inter_ref, psq_ref, tsq_ref, bce_ref, *,
                     s_total, n_classes, tile_rows, sub, tiles_per_chunk,
                     num_tiles, full_tiles, need_mask, do_softmax):
    """One (batch b, chunk c, row-tile i) grid step.

    x_ref:  (C, tile_rows, 128)   logits slab (any float dtype)
    t_ref:  (tile_rows, 128)      integer labels
    *_ref:  (C, sub, 128)         per-(batch, chunk, channel) accumulators
                                  (output blocks revisited across the row axis)
    """
    c_idx = pl.program_id(1)
    i = pl.program_id(2)

    @pl.when(i == 0)
    def _init():
        inter_ref[...] = jnp.zeros_like(inter_ref)
        psq_ref[...] = jnp.zeros_like(psq_ref)
        tsq_ref[...] = jnp.zeros_like(tsq_ref)
        bce_ref[...] = jnp.zeros_like(bce_ref)

    # Unclamped global row-tile index (the input index_map may clamp it, but
    # masking below is computed from the *unclamped* value, so overshoot
    # steps and the ragged tail are automatically neutralised).
    t_global = c_idx * tiles_per_chunk + i

    groups = max(tile_rows // sub, 1)

    def _fold(a):
        # (C, tile_rows, 128) -> (C, sub, 128) with cross-vreg VPU adds only
        # (the reshape groups exactly 8 consecutive rows == one vreg).
        if sub == 1:
            return jnp.sum(a, axis=1, keepdims=True)
        return jnp.sum(a.reshape(n_classes, groups, sub, 128), axis=1)

    def _accum(valid):
        x = x_ref[...].astype(jnp.float32)            # (C, TR, 128)
        lab = t_ref[...].astype(jnp.int32)            # (TR, 128)

        if do_softmax:
            m = jnp.max(x, axis=0, keepdims=True)
            e = jnp.exp(x - m)
            denom = jnp.sum(e, axis=0, keepdims=True)          # denom >= 1
            r = pl.reciprocal(denom, approx=True)              # EUP slot
            r = r * (2.0 - denom * r)                          # Newton 1
            r = r * (2.0 - denom * r)                          # Newton 2
            p = e * r
        else:
            p = x

        ci = jax.lax.broadcasted_iota(jnp.int32, x.shape, 0)
        onehot = (ci == lab[None, :, :]).astype(jnp.float32)
        if valid is not None:
            vm = valid[None, :, :]
            onehot = jnp.where(vm, onehot, 0.0)
            p_use = jnp.where(vm, p, 0.0)
        else:
            p_use = p

        po = p_use * onehot                            # reused: inter + BCE

        # Per-channel Dice statistics (pow=True branch of binary_dice_loss).
        inter_ref[...] += _fold(po)
        psq_ref[...] += _fold(p_use * p_use)
        tsq_ref[...] += _fold(onehot)                  # onehot^2 == onehot

        # BCEWithLogitsLoss applied to the (softmax) probabilities — exactly
        # what the PyTorch module does (inputs is re-assigned after softmax).
        if do_softmax:
            bce = p - po + jnp.log1p(jnp.exp(-p))      # p >= 0 here
        else:
            bce = jnp.maximum(p, 0.0) - po + jnp.log1p(jnp.exp(-jnp.abs(p)))
        if valid is not None:
            bce = jnp.where(valid[None, :, :], bce, 0.0)
        bce_ref[...] += _fold(bce)

    def _do_masked():
        row = jax.lax.broadcasted_iota(jnp.int32, (tile_rows, 128), 0)
        lane = jax.lax.broadcasted_iota(jnp.int32, (tile_rows, 128), 1)
        flat = (t_global * tile_rows + row) * 128 + lane
        _accum(flat < s_total)

    if not need_mask:
        # Static fast path: every step covers only valid voxels.
        _accum(None)
    elif full_tiles == 0:
        @pl.when(t_global < num_tiles)
        def _all_masked():
            _do_masked()
    else:
        @pl.when(t_global < full_tiles)
        def _fast():
            _accum(None)

        @pl.when(jnp.logical_and(t_global >= full_tiles,
                                 t_global < num_tiles))
        def _edge():
            _do_masked()
        # t_global >= num_tiles (overshoot step of an odd tile split): skip.


def bce_dice_loss(inputs, target, *, do_softmax=True, smooth=1e-6,
                  max_tile_rows=2048):
    """inputs: (B, C, Z, Y, X) float logits; target: (B, Z, Y, X) int labels."""
    B, C, Z, Y, X = inputs.shape
    S = Z * Y * X
    N = B * S

    # Natural NCDHW layout: only free reshapes, no transpose of the volume.
    logits = inputs.reshape(B, C, S)
    tgt_dtype = jnp.int8 if C <= 127 else jnp.int32
    tgt = target.reshape(B, S).astype(tgt_dtype)

    R = pl.cdiv(S, 128)
    s_pad = R * 128
    if s_pad != S:
        # TODO(synk): fuse this <128-lane tail pad into the producer (or
        # manual-DMA the ragged tail) to avoid an extra HBM copy of the volume.
        logits = jnp.pad(logits, ((0, 0), (0, 0), (0, s_pad - S)))
        tgt = jnp.pad(tgt, ((0, 0), (0, s_pad - S)))
    logits = logits.reshape(B, C, R, 128)
    tgt = tgt.reshape(B, R, 128)

    in_item = logits.dtype.itemsize
    tgt_item = tgt.dtype.itemsize
    row_bytes = 128 * (C * in_item + tgt_item)

    # Generation-aware VMEM budget (v5e/v6e 128 MiB, v7x 64 MiB per TC).
    try:
        vmem_cap = int(pltpu.get_tpu_info().vmem_capacity_bytes)
    except Exception:
        vmem_cap = 64 * 1024 * 1024
    out_bytes_est = 2 * 4 * C * 8 * 128 * 4
    budget = (vmem_cap * 7) // 10 - out_bytes_est

    cap = max(32, min(int(max_tile_rows),
                      ((budget // (2 * row_bytes)) // 32) * 32))
    tile_rows = R if R <= cap else cap      # full dim, or a multiple of 32
    sub = 8 if tile_rows % 8 == 0 else 1    # sublane-dense accumulator depth
    num_tiles = pl.cdiv(R, tile_rows)

    # Size-2 parallel chunk axis so v7x's 2 TensorCores split the row range
    # even when B is 1; harmless extra loop level on single-TC chips.
    chunks = 2 if num_tiles >= 2 else 1
    tiles_per_chunk = pl.cdiv(num_tiles, chunks)
    overshoot = chunks * tiles_per_chunk != num_tiles

    tile_block = tile_rows * 128
    full_tiles = S // tile_block            # tiles containing only valid voxels
    need_mask = (num_tiles * tile_block != S) or overshoot

    kernel = functools.partial(
        _bce_dice_kernel, s_total=S, n_classes=C, tile_rows=tile_rows, sub=sub,
        tiles_per_chunk=tiles_per_chunk, num_tiles=num_tiles,
        full_tiles=full_tiles, need_mask=need_mask, do_softmax=do_softmax)

    stat_shape = jax.ShapeDtypeStruct((B, chunks, C, sub, 128), jnp.float32)
    stat_spec = pl.BlockSpec((None, None, C, sub, 128),
                             lambda b, c, i: (b, c, 0, 0, 0))

    if overshoot:
        def row_block(c, i):
            return jnp.minimum(c * tiles_per_chunk + i, num_tiles - 1)
    else:
        def row_block(c, i):
            return c * tiles_per_chunk + i

    def x_map(b, c, i):
        return (b, 0, row_block(c, i), 0)

    def t_map(b, c, i):
        return (b, row_block(c, i), 0)

    block_in_bytes = tile_rows * row_bytes
    out_bytes = 4 * C * sub * 128 * 4
    needed = 2 * block_in_bytes + 2 * out_bytes
    vmem_limit = int(min(vmem_cap, max(needed + (16 << 20), 32 << 20)))

    cost = pl.CostEstimate(
        flops=int(20 * B * C * S),
        transcendentals=int(3 * B * C * S),
        bytes_accessed=int(B * s_pad * (C * in_item + tgt_item)
                           + 4 * B * chunks * C * sub * 128 * 4))

    inter, psq, tsq, bce = pl.pallas_call(
        kernel,
        out_shape=(stat_shape, stat_shape, stat_shape, stat_shape),
        grid_spec=pltpu.PrefetchScalarGridSpec(
            num_scalar_prefetch=0,
            grid=(B, chunks, tiles_per_chunk),
            in_specs=[
                pl.BlockSpec((None, C, tile_rows, 128), x_map),
                pl.BlockSpec((None, tile_rows, 128), t_map),
            ],
            out_specs=[stat_spec, stat_spec, stat_spec, stat_spec],
        ),
        compiler_params=pltpu.CompilerParams(
            dimension_semantics=("parallel", "parallel", "arbitrary"),
            vmem_limit_bytes=vmem_limit),
        cost_estimate=cost,
    )(logits, tgt)

    # Tiny O(B*chunks*C*sub*128) epilogue in plain JAX: fold the batch / chunk
    # / sublane / lane partials, then dice + bce combine (matches PyTorch).
    inter = jnp.sum(inter, axis=(0, 1, 3, 4))
    psq = jnp.sum(psq, axis=(0, 1, 3, 4))
    tsq = jnp.sum(tsq, axis=(0, 1, 3, 4))
    bce_sum = jnp.sum(bce)

    dice = (2.0 * inter + smooth) / (psq + tsq + smooth)
    mean_dice_loss = jnp.mean(1.0 - dice)
    bce_mean = bce_sum / (C * N)
    return 0.5 * mean_dice_loss + 0.5 * bce_mean


def _reference(inputs, target, do_softmax=True, smooth=1e-6):
    C = inputs.shape[1]
    x = inputs.astype(jnp.float32)
    p = jax.nn.softmax(x, axis=1) if do_softmax else x
    onehot = jax.nn.one_hot(target, C, axis=1, dtype=jnp.float32)
    inter = jnp.sum(p * onehot, axis=(0, 2, 3, 4))
    psq = jnp.sum(p * p, axis=(0, 2, 3, 4))
    tsq = jnp.sum(onehot, axis=(0, 2, 3, 4))
    dice_loss = 1.0 - (2.0 * inter + smooth) / (psq + tsq + smooth)
    mean_dice = jnp.mean(dice_loss)
    bce = jnp.maximum(p, 0.0) - p * onehot + jnp.log1p(jnp.exp(-jnp.abs(p)))
    return 0.5 * mean_dice + 0.5 * jnp.mean(bce)


if __name__ == "__main__":
    key = jax.random.PRNGKey(0)
    k1, k2, k3, k4, k5, k6, k7, k8 = jax.random.split(key, 8)

    # 1) Small default case: single tile, single chunk, no masking.
    B, C, Z, Y, X = 2, 4, 4, 8, 16
    inputs = jax.random.normal(k1, (B, C, Z, Y, X), dtype=jnp.float32)
    target = jax.random.randint(k2, (B, Z, Y, X), 0, C, dtype=jnp.int32)
    loss = jax.block_until_ready(bce_dice_loss(inputs, target))
    ref = jax.block_until_ready(_reference(inputs, target))
    np.testing.assert_allclose(np.asarray(loss), np.asarray(ref),
                               rtol=1e-5, atol=1e-5)

    # 2) Ragged last tile + odd tile count split across 2 chunks (exercises
    #    the masked edge path, the overshoot skip, and the clamped index_map).
    B2, C2, Z2, Y2, X2 = 1, 4, 8, 32, 33
    inputs2 = jax.random.normal(k3, (B2, C2, Z2, Y2, X2), dtype=jnp.float32)
    target2 = jax.random.randint(k4, (B2, Z2, Y2, X2), 0, C2, dtype=jnp.int32)
    loss2 = jax.block_until_ready(
        bce_dice_loss(inputs2, target2, max_tile_rows=32))
    ref2 = jax.block_until_ready(_reference(inputs2, target2))
    np.testing.assert_allclose(np.asarray(loss2), np.asarray(ref2),
                               rtol=2e-5, atol=2e-5)

    # 3) Even tile count split across 2 chunks: pure fast path, no masking.
    B3, C3, Z3, Y3, X3 = 1, 4, 8, 32, 32
    inputs3 = jax.random.normal(k5, (B3, C3, Z3, Y3, X3), dtype=jnp.float32)
    target3 = jax.random.randint(k6, (B3, Z3, Y3, X3), 0, C3, dtype=jnp.int32)
    loss3 = jax.block_until_ready(
        bce_dice_loss(inputs3, target3, max_tile_rows=32))
    ref3 = jax.block_until_ready(_reference(inputs3, target3))
    np.testing.assert_allclose(np.asarray(loss3), np.asarray(ref3),
                               rtol=2e-5, atol=2e-5)

    # 4) Module-default class count (n_classes=16), sublane-dense accumulators.
    B4, C4, Z4, Y4, X4 = 1, 16, 8, 16, 16
    inputs4 = jax.random.normal(k7, (B4, C4, Z4, Y4, X4), dtype=jnp.float32)
    target4 = jax.random.randint(k8, (B4, Z4, Y4, X4), 0, C4, dtype=jnp.int32)
    loss4 = jax.block_until_ready(bce_dice_loss(inputs4, target4))
    ref4 = jax.block_until_ready(_reference(inputs4, target4))
    np.testing.assert_allclose(np.asarray(loss4), np.asarray(ref4),
                               rtol=2e-5, atol=2e-5)

    print("KERNEL_OK")
</pallas_src>

<mosaic_0001>
module attributes {stable_mosaic.version = 11 : i64} {
  func.func @_bce_dice_kernel(%arg0: i32, %arg1: i32, %arg2: i32, %arg3: memref<1x4x4x128xf32, #tpu.memory_space<vmem>>, %arg4: memref<1x4x128xi8, #tpu.memory_space<vmem>>, %arg5: memref<1x1x4x1x128xf32, #tpu.memory_space<vmem>>, %arg6: memref<1x1x4x1x128xf32, #tpu.memory_space<vmem>>, %arg7: memref<1x1x4x1x128xf32, #tpu.memory_space<vmem>>, %arg8: memref<1x1x4x1x128xf32, #tpu.memory_space<vmem>>) attributes {dimension_semantics = [#tpu.dimension_semantics<parallel>, #tpu.dimension_semantics<parallel>, #tpu.dimension_semantics<arbitrary>], iteration_bounds = array<i64: 2, 1, 1>, scalar_prefetch = 0 : i64, scratch_operands = 0 : i64, tpu.core_type = #tpu.core_type<tc>, window_params = [{transform_indices = @transform_0, window_bounds = array<i64: 1, 4, 4, 128>}, {transform_indices = @transform_1, window_bounds = array<i64: 1, 4, 128>}, {transform_indices = @transform_2, window_bounds = array<i64: 1, 1, 4, 1, 128>}, {transform_indices = @transform_3, window_bounds = array<i64: 1, 1, 4, 1, 128>}, {transform_indices = @transform_4, window_bounds = array<i64: 1, 1, 4, 1, 128>}, {transform_indices = @transform_5, window_bounds = array<i64: 1, 1, 4, 1, 128>}]} {
    %c0_i32 = arith.constant 0 : i32
    %0 = arith.cmpi eq, %arg2, %c0_i32 : i32
    %1 = arith.extui %0 : i1 to i32
    %c0_i32_0 = arith.constant 0 : i32
    %2 = arith.cmpi ne, %1, %c0_i32_0 : i32
    scf.if %2 {
      %cst_55 = arith.constant 0.000000e+00 : f32
      %72 = vector.broadcast %cst_55 : f32 to vector<4x1x128xf32>
      %c0_56 = arith.constant 0 : index
      %c0_57 = arith.constant 0 : index
      %c0_58 = arith.constant 0 : index
      %c0_59 = arith.constant 0 : index
      %c0_60 = arith.constant 0 : index
      %73 = vector.load %arg5[%c0_56, %c0_57, %c0_58, %c0_59, %c0_60] : memref<1x1x4x1x128xf32, #tpu.memory_space<vmem>>, vector<1x1x4x1x128xf32>
      %74 = vector.shape_cast %73 : vector<1x1x4x1x128xf32> to vector<4x1x128xf32>
      %75 = vector.shape_cast %72 : vector<4x1x128xf32> to vector<1x1x4x1x128xf32>
      tpu.vector_store %arg5[%c0_56, %c0_57, %c0_58, %c0_59, %c0_60], %75 {strides = array<i32>} : memref<1x1x4x1x128xf32, #tpu.memory_space<vmem>>, vector<1x1x4x1x128xf32>,
      %cst_61 = arith.constant 0.000000e+00 : f32
      %76 = vector.broadcast %cst_61 : f32 to vector<4x1x128xf32>
      %c0_62 = arith.constant 0 : index
      %c0_63 = arith.constant 0 : index
      %c0_64 = arith.constant 0 : index
      %c0_65 = arith.constant 0 : index
      %c0_66 = arith.constant 0 : index
      %77 = vector.load %arg6[%c0_62, %c0_63, %c0_64, %c0_65, %c0_66] : memref<1x1x4x1x128xf32, #tpu.memory_space<vmem>>, vector<1x1x4x1x128xf32>
      %78 = vector.shape_cast %77 : vector<1x1x4x1x128xf32> to vector<4x1x128xf32>
      %79 = vector.shape_cast %76 : vector<4x1x128xf32> to vector<1x1x4x1x128xf32>
      tpu.vector_store %arg6[%c0_62, %c0_63, %c0_64, %c0_65, %c0_66], %79 {strides = array<i32>} : memref<1x1x4x1x128xf32, #tpu.memory_space<vmem>>, vector<1x1x4x1x128xf32>,
      %cst_67 = arith.constant 0.000000e+00 : f32
      %80 = vector.broadcast %cst_67 : f32 to vector<4x1x128xf32>
      %c0_68 = arith.constant 0 : index
      %c0_69 = arith.constant 0 : index
      %c0_70 = arith.constant 0 : index
      %c0_71 = arith.constant 0 : index
      %c0_72 = arith.constant 0 : index
      %81 = vector.load %arg7[%c0_68, %c0_69, %c0_70, %c0_71, %c0_72] : memref<1x1x4x1x128xf32, #tpu.memory_space<vmem>>, vector<1x1x4x1x128xf32>
      %82 = vector.shape_cast %81 : vector<1x1x4x1x128xf32> to vector<4x1x128xf32>
      %83 = vector.shape_cast %80 : vector<4x1x128xf32> to vector<1x1x4x1x128xf32>
      tpu.vector_store %arg7[%c0_68, %c0_69, %c0_70, %c0_71, %c0_72], %83 {strides = array<i32>} : memref<1x1x4x1x128xf32, #tpu.memory_space<vmem>>, vector<1x1x4x1x128xf32>,
      %cst_73 = arith.constant 0.000000e+00 : f32
      %84 = vector.broadcast %cst_73 : f32 to vector<4x1x128xf32>
      %c0_74 = arith.constant 0 : index
      %c0_75 = arith.constant 0 : index
      %c0_76 = arith.constant 0 : index
      %c0_77 = arith.constant 0 : index
      %c0_78 = arith.constant 0 : index
      %85 = vector.load %arg8[%c0_74, %c0_75, %c0_76, %c0_77, %c0_78] : memref<1x1x4x1x128xf32, #tpu.memory_space<vmem>>, vector<1x1x4x1x128xf32>
      %86 = vector.shape_cast %85 : vector<1x1x4x1x128xf32> to vector<4x1x128xf32>
      %87 = vector.shape_cast %84 : vector<4x1x128xf32> to vector<1x1x4x1x128xf32>
      tpu.vector_store %arg8[%c0_74, %c0_75, %c0_76, %c0_77, %c0_78], %87 {strides = array<i32>} : memref<1x1x4x1x128xf32, #tpu.memory_space<vmem>>, vector<1x1x4x1x128xf32>,
    } else {
    }
    %c0 = arith.constant 0 : index
    %c0_1 = arith.constant 0 : index
    %c0_2 = arith.constant 0 : index
    %c0_3 = arith.constant 0 : index
    %3 = vector.load %arg3[%c0, %c0_1, %c0_2, %c0_3] : memref<1x4x4x128xf32, #tpu.memory_space<vmem>>, vector<1x4x4x128xf32>
    %4 = vector.shape_cast %3 : vector<1x4x4x128xf32> to vector<4x4x128xf32>
    %c0_4 = arith.constant 0 : index
    %c0_5 = arith.constant 0 : index
    %c0_6 = arith.constant 0 : index
    %5 = vector.load %arg4[%c0_4, %c0_5, %c0_6] : memref<1x4x128xi8, #tpu.memory_space<vmem>>, vector<1x4x128xi8>
    %6 = vector.shape_cast %5 : vector<1x4x128xi8> to vector<4x128xi8>
    %7 = arith.extsi %6 : vector<4x128xi8> to vector<4x128xi32>
    %cst = arith.constant dense<0xFF800000> : vector<4x128xf32>
    %8 = vector.multi_reduction <maximumf>, %4, %cst [0] : vector<4x4x128xf32> to vector<4x128xf32>
    %9 = vector.shape_cast %8 : vector<4x128xf32> to vector<1x4x128xf32>
    %10 = vector.broadcast %9 : vector<1x4x128xf32> to vector<4x4x128xf32>
    %11 = arith.subf %4, %10 : vector<4x4x128xf32>
    %12 = math.exp %11 : vector<4x4x128xf32>
    %cst_7 = arith.constant dense<0.000000e+00> : vector<4x128xf32>
    %13 = vector.multi_reduction <add>, %12, %cst_7 [0] : vector<4x4x128xf32> to vector<4x128xf32>
    %14 = vector.shape_cast %13 : vector<4x128xf32> to vector<1x4x128xf32>
    %15 = tpu.reciprocal %14 {approx = true} : vector<1x4x128xf32> -> vector<1x4x128xf32>
    %16 = arith.mulf %14, %15 : vector<1x4x128xf32>
    %cst_8 = arith.constant 2.000000e+00 : f32
    %17 = vector.broadcast %cst_8 : f32 to vector<1x4x128xf32>
    %18 = arith.subf %17, %16 : vector<1x4x128xf32>
    %19 = arith.mulf %15, %18 : vector<1x4x128xf32>
    %20 = arith.mulf %14, %19 : vector<1x4x128xf32>
    %cst_9 = arith.constant 2.000000e+00 : f32
    %21 = vector.broadcast %cst_9 : f32 to vector<1x4x128xf32>
    %22 = arith.subf %21, %20 : vector<1x4x128xf32>
    %23 = arith.mulf %19, %22 : vector<1x4x128xf32>
    %24 = vector.broadcast %23 : vector<1x4x128xf32> to vector<4x4x128xf32>
    %25 = arith.mulf %12, %24 : vector<4x4x128xf32>
    %26 = tpu.iota {dimensions = array<i32: 0>} : vector<4x4x128xi32>
    %27 = vector.shape_cast %7 : vector<4x128xi32> to vector<1x4x128xi32>
    %28 = vector.broadcast %27 : vector<1x4x128xi32> to vector<4x4x128xi32>
    %29 = arith.cmpi eq, %26, %28 : vector<4x4x128xi32>
    %30 = arith.extui %29 : vector<4x4x128xi1> to vector<4x4x128xi32>
    %31 = arith.sitofp %30 : vector<4x4x128xi32> to vector<4x4x128xf32>
    %32 = arith.mulf %25, %31 : vector<4x4x128xf32>
    %c0_10 = arith.constant 0 : index
    %c0_11 = arith.constant 0 : index
    %c0_12 = arith.constant 0 : index
    %c0_13 = arith.constant 0 : index
    %c0_14 = arith.constant 0 : index
    %33 = vector.load %arg5[%c0_10, %c0_11, %c0_12, %c0_13, %c0_14] : memref<1x1x4x1x128xf32, #tpu.memory_space<vmem>>, vector<1x1x4x1x128xf32>
    %34 = vector.shape_cast %33 : vector<1x1x4x1x128xf32> to vector<4x1x128xf32>
    %cst_15 = arith.constant dense<0.000000e+00> : vector<4x128xf32>
    %35 = vector.multi_reduction <add>, %32, %cst_15 [1] : vector<4x4x128xf32> to vector<4x128xf32>
    %36 = vector.shape_cast %35 : vector<4x128xf32> to vector<4x1x128xf32>
    %37 = arith.addf %34, %36 : vector<4x1x128xf32>
    %c0_16 = arith.constant 0 : index
    %c0_17 = arith.constant 0 : index
    %c0_18 = arith.constant 0 : index
    %c0_19 = arith.constant 0 : index
    %c0_20 = arith.constant 0 : index
    %38 = vector.load %arg5[%c0_16, %c0_17, %c0_18, %c0_19, %c0_20] : memref<1x1x4x1x128xf32, #tpu.memory_space<vmem>>, vector<1x1x4x1x128xf32>
    %39 = vector.shape_cast %38 : vector<1x1x4x1x128xf32> to vector<4x1x128xf32>
    %40 = vector.shape_cast %37 : vector<4x1x128xf32> to vector<1x1x4x1x128xf32>
    tpu.vector_store %arg5[%c0_16, %c0_17, %c0_18, %c0_19, %c0_20], %40 {strides = array<i32>} : memref<1x1x4x1x128xf32, #tpu.memory_space<vmem>>, vector<1x1x4x1x128xf32>,
    %c0_21 = arith.constant 0 : index
    %c0_22 = arith.constant 0 : index
    %c0_23 = arith.constant 0 : index
    %c0_24 = arith.constant 0 : index
    %c0_25 = arith.constant 0 : index
    %41 = vector.load %arg6[%c0_21, %c0_22, %c0_23, %c0_24, %c0_25] : memref<1x1x4x1x128xf32, #tpu.memory_space<vmem>>, vector<1x1x4x1x128xf32>
    %42 = vector.shape_cast %41 : vector<1x1x4x1x128xf32> to vector<4x1x128xf32>
    %43 = arith.mulf %25, %25 : vector<4x4x128xf32>
    %cst_26 = arith.constant dense<0.000000e+00> : vector<4x128xf32>
    %44 = vector.multi_reduction <add>, %43, %cst_26 [1] : vector<4x4x128xf32> to vector<4x128xf32>
    %45 = vector.shape_cast %44 : vector<4x128xf32> to vector<4x1x128xf32>
    %46 = arith.addf %42, %45 : vector<4x1x128xf32>
    %c0_27 = arith.constant 0 : index
    %c0_28 = arith.constant 0 : index
    %c0_29 = arith.constant 0 : index
    %c0_30 = arith.constant 0 : index
    %c0_31 = arith.constant 0 : index
    %47 = vector.load %arg6[%c0_27, %c0_28, %c0_29, %c0_30, %c0_31] : memref<1x1x4x1x128xf32, #tpu.memory_space<vmem>>, vector<1x1x4x1x128xf32>
    %48 = vector.shape_cast %47 : vector<1x1x4x1x128xf32> to vector<4x1x128xf32>
    %49 = vector.shape_cast %46 : vector<4x1x128xf32> to vector<1x1x4x1x128xf32>
    tpu.vector_store %arg6[%c0_27, %c0_28, %c0_29, %c0_30, %c0_31], %49 {strides = array<i32>} : memref<1x1x4x1x128xf32, #tpu.memory_space<vmem>>, vector<1x1x4x1x128xf32>,
    %c0_32 = arith.constant 0 : index
    %c0_33 = arith.constant 0 : index
    %c0_34 = arith.constant 0 : index
    %c0_35 = arith.constant 0 : index
    %c0_36 = arith.constant 0 : index
    %50 = vector.load %arg7[%c0_32, %c0_33, %c0_34, %c0_35, %c0_36] : memref<1x1x4x1x128xf32, #tpu.memory_space<vmem>>, vector<1x1x4x1x128xf32>
    %51 = vector.shape_cast %50 : vector<1x1x4x1x128xf32> to vector<4x1x128xf32>
    %cst_37 = arith.constant dense<0.000000e+00> : vector<4x128xf32>
    %52 = vector.multi_reduction <add>, %31, %cst_37 [1] : vector<4x4x128xf32> to vector<4x128xf32>
    %53 = vector.shape_cast %52 : vector<4x128xf32> to vector<4x1x128xf32>
    %54 = arith.addf %51, %53 : vector<4x1x128xf32>
    %c0_38 = arith.constant 0 : index
    %c0_39 = arith.constant 0 : index
    %c0_40 = arith.constant 0 : index
    %c0_41 = arith.constant 0 : index
    %c0_42 = arith.constant 0 : index
    %55 = vector.load %arg7[%c0_38, %c0_39, %c0_40, %c0_41, %c0_42] : memref<1x1x4x1x128xf32, #tpu.memory_space<vmem>>, vector<1x1x4x1x128xf32>
    %56 = vector.shape_cast %55 : vector<1x1x4x1x128xf32> to vector<4x1x128xf32>
    %57 = vector.shape_cast %54 : vector<4x1x128xf32> to vector<1x1x4x1x128xf32>
    tpu.vector_store %arg7[%c0_38, %c0_39, %c0_40, %c0_41, %c0_42], %57 {strides = array<i32>} : memref<1x1x4x1x128xf32, #tpu.memory_space<vmem>>, vector<1x1x4x1x128xf32>,
    %58 = arith.subf %25, %32 : vector<4x4x128xf32>
    %cst_43 = arith.constant 0.000000e+00 : f32
    %59 = vector.broadcast %cst_43 : f32 to vector<4x4x128xf32>
    %60 = arith.subf %59, %25 : vector<4x4x128xf32>
    %61 = math.exp %60 : vector<4x4x128xf32>
    %62 = math.log1p %61 : vector<4x4x128xf32>
    %63 = arith.addf %58, %62 : vector<4x4x128xf32>
    %c0_44 = arith.constant 0 : index
    %c0_45 = arith.constant 0 : index
    %c0_46 = arith.constant 0 : index
    %c0_47 = arith.constant 0 : index
    %c0_48 = arith.constant 0 : index
    %64 = vector.load %arg8[%c0_44, %c0_45, %c0_46, %c0_47, %c0_48] : memref<1x1x4x1x128xf32, #tpu.memory_space<vmem>>, vector<1x1x4x1x128xf32>
    %65 = vector.shape_cast %64 : vector<1x1x4x1x128xf32> to vector<4x1x128xf32>
    %cst_49 = arith.constant dense<0.000000e+00> : vector<4x128xf32>
    %66 = vector.multi_reduction <add>, %63, %cst_49 [1] : vector<4x4x128xf32> to vector<4x128xf32>
    %67 = vector.shape_cast %66 : vector<4x128xf32> to vector<4x1x128xf32>
    %68 = arith.addf %65, %67 : vector<4x1x128xf32>
    %c0_50 = arith.constant 0 : index
    %c0_51 = arith.constant 0 : index
    %c0_52 = arith.constant 0 : index
    %c0_53 = arith.constant 0 : index
    %c0_54 = arith.constant 0 : index
    %69 = vector.load %arg8[%c0_50, %c0_51, %c0_52, %c0_53, %c0_54] : memref<1x1x4x1x128xf32, #tpu.memory_space<vmem>>, vector<1x1x4x1x128xf32>
    %70 = vector.shape_cast %69 : vector<1x1x4x1x128xf32> to vector<4x1x128xf32>
    %71 = vector.shape_cast %68 : vector<4x1x128xf32> to vector<1x1x4x1x128xf32>
    tpu.vector_store %arg8[%c0_50, %c0_51, %c0_52, %c0_53, %c0_54], %71 {strides = array<i32>} : memref<1x1x4x1x128xf32, #tpu.memory_space<vmem>>, vector<1x1x4x1x128xf32>,
    return
  }
  func.func @transform_0(%arg0: i32, %arg1: i32, %arg2: i32) -> (i32, i32, i32, i32) {
    %c1_i32 = arith.constant 1 : i32
    %0 = arith.muli %arg1, %c1_i32 : i32
    %1 = arith.addi %0, %arg2 : i32
    %c0_i32 = arith.constant 0 : i32
    %c0_i32_0 = arith.constant 0 : i32
    %c0_i32_1 = arith.constant 0 : i32
    return %arg0, %c0_i32, %1, %c0_i32_0 : i32, i32, i32, i32
  }
  func.func @transform_1(%arg0: i32, %arg1: i32, %arg2: i32) -> (i32, i32, i32) {
    %c1_i32 = arith.constant 1 : i32
    %0 = arith.muli %arg1, %c1_i32 : i32
    %1 = arith.addi %0, %arg2 : i32
    %c0_i32 = arith.constant 0 : i32
    %c0_i32_0 = arith.constant 0 : i32
    return %arg0, %1, %c0_i32 : i32, i32, i32
  }
  func.func @transform_2(%arg0: i32, %arg1: i32, %arg2: i32) -> (i32, i32, i32, i32, i32) {
    %c0_i32 = arith.constant 0 : i32
    %c0_i32_0 = arith.constant 0 : i32
    %c0_i32_1 = arith.constant 0 : i32
    %c0_i32_2 = arith.constant 0 : i32
    return %arg0, %arg1, %c0_i32, %c0_i32_0, %c0_i32_1 : i32, i32, i32, i32, i32
  }
  func.func @transform_3(%arg0: i32, %arg1: i32, %arg2: i32) -> (i32, i32, i32, i32, i32) {
    %c0_i32 = arith.constant 0 : i32
    %c0_i32_0 = arith.constant 0 : i32
    %c0_i32_1 = arith.constant 0 : i32
    %c0_i32_2 = arith.constant 0 : i32
    return %arg0, %arg1, %c0_i32, %c0_i32_0, %c0_i32_1 : i32, i32, i32, i32, i32
  }
  func.func @transform_4(%arg0: i32, %arg1: i32, %arg2: i32) -> (i32, i32, i32, i32, i32) {
    %c0_i32 = arith.constant 0 : i32
    %c0_i32_0 = arith.constant 0 : i32
    %c0_i32_1 = arith.constant 0 : i32
    %c0_i32_2 = arith.constant 0 : i32
    return %arg0, %arg1, %c0_i32, %c0_i32_0, %c0_i32_1 : i32, i32, i32, i32, i32
  }
  func.func @transform_5(%arg0: i32, %arg1: i32, %arg2: i32) -> (i32, i32, i32, i32, i32) {
    %c0_i32 = arith.constant 0 : i32
    %c0_i32_0 = arith.constant 0 : i32
    %c0_i32_1 = arith.constant 0 : i32
    %c0_i32_2 = arith.constant 0 : i32
    return %arg0, %arg1, %c0_i32, %c0_i32_0, %c0_i32_1 : i32, i32, i32, i32, i32
  }
}

</mosaic_0001>

<bundles_post_ra>
// kernel: tpu_custom_call.1
= control target key start
LH: loop header
LB: loop body
LE: loop exit
PB: predicated region body
PF: predicated region fallthrough
CT: control target
= control target key end

     0   :  { %s1841_s0 = inlined_call_operand.hbm [shape: f32[2,4,4,128], index: 0, kind: input, shape index: {}]   ;;  %s1842_s1 = inlined_call_operand.hbm [shape: s8[2,4,128], index: 1, kind: input, shape index: {}]   ;;  %s1843_s2 = inlined_call_operand.hbm [shape: f32[2,1,4,1,128], index: 2, kind: output, shape index: {0}]   ;;  %s1844_s3 = inlined_call_operand.hbm [shape: f32[2,1,4,1,128], index: 3, kind: output, shape index: {1}]   ;;  %s1845_s4 = inlined_call_operand.hbm [shape: f32[2,1,4,1,128], index: 4, kind: output, shape index: {2}]   ;;  %s1846_s5 = inlined_call_operand.hbm [shape: f32[2,1,4,1,128], index: 5, kind: output, shape index: {3}]  }
   0x1   :  { %1849 = sst [smem:[#allocation20_spill]] %s1841_s0 }
   0x2   :  { %11 = vsyncpa [#allocation3], 0 }
   0x3   :  { %13 = vsyncpa [#allocation3 + $0x1], 0 }
   0x4   :  { %14 = vsyncpa [#allocation6], 0 }
   0x5   :  { %16 = vsyncpa [#allocation6 + $0x1], 0 }
   0x6   :  { %17 = vsyncpa [#allocation4], 0 }
   0x7   :  { %19 = vsyncpa [#allocation4 + $0x1], 0 }
   0x8   :  { %20 = vsyncpa [#allocation9], 0 }
   0x9   :  { %22 = vsyncpa [#allocation9 + $0x1], 0 }
   0xa   :  { %23 = vsyncpa [#allocation12], 0 }
   0xb   :  { %25 = vsyncpa [#allocation12 + $0x1], 0  ;;  %s1364_s18 = smov 0   ;;  %s1366_s19 = smov 0  }
   0xc   :  { %s1368_s20 = smov 0   ;;  %s1370_s21 = smov 0  }
   0xd   :  { %s1372_s22 = smov 0   ;;  %s1374_s23 = smov 0  }
   0xe LB: > { %s1395_s24 = sadd.s32 4294967295, %s1321_s23   ;;  %s1847_s25 = sadd.s32 4294967294, %s1321_s23   ;;  %s1321_s23 = sphi %s1374_s23, %s31_s23   ;;  %s1317_s22 = sphi %s1372_s22, %s1866_s22   ;;  %s1313_s21 = sphi %s1370_s21, %s1865_s21   ;;  %s1309_s20 = sphi %s1368_s20, %s1864_s20   ;;  %s1305_s19 = sphi %s1366_s19, %s1863_s19   ;;  %s1301_s18 = sphi %s1364_s18, %s1862_s18  }
   0xf   : > { %s50_s26 = sadd.s32 1, %s1317_s22  ;;  %s61_s27 = sadd.s32 1, %s1309_s20 }
  0x10   : > { %p52_p0 = scmp.ge.s32.totalorder %s50_s26, 2  ;;  %p68_p1 = scmp.ne.s32.totalorder %s1309_s20, %s1305_s19 }
  0x11   : > { %p69_p2 = scmp.eq.s32.totalorder %s1321_s23, 0  ;;  %p74_p3 = scmp.ne.s32.totalorder %s1305_s19, %s1301_s18 }
  0x12   : > { %s1868_s26 = smov (%p52_p0, %s50_s26), 0  ;;  %p75_p5 = scmp.eq.s32.totalorder %s1395_s24, 0 }
  0x13   : > { %1850 = sst [smem:[#allocation18_spill]] %s1868_s26  ;;  %p1407_p4 = por %p69_p2, %p68_p1 }
  0x14   : > { %s56_s29 = ssub.s32 %s1317_s22, %s1868_s26  ;;  %p130_p6 = scmp.eq.s32.totalorder %s1395_s24, 1 }
  0x15   : > { %p59_p7 = scmp.eq.s32.totalorder %s56_s29, 0  ;;  %p1415_p8 = por %p75_p5, %p74_p3 }
  0x16   : > { %p1419_p9 = por %p130_p6, %p68_p1  ;;  %p136_p10 = scmp.eq.s32.totalorder %s1847_s25, 1 }
  0x17   : > { %s1426_s7 = scalar_select %p59_p7, %s1309_s20, %s61_s27  }
  0x18   : > { %p1428_p11 = por %p136_p10, %p74_p3  ;;  %p948_p12 = scmp.ge.s32.totalorder %s1321_s23, 2 }
  0x19   : > { %1854 = sst [smem:[#allocation19_spill]] %s1426_s7  ;;  %p1014_p13 = scmp.lt.s32.totalorder %s1321_s23, 2 }
  0x1a   : > { %s1435_s9 = sand.u32 1, %s1309_s20   ;;  %s977_s11 = sshll.u32 %s1317_s22, 8 }
  0x1b   : > { %s949_s10 = sshll.u32 %s1435_s9, 4  ;;  %s1856_s0 = sld [smem:[#allocation20_spill]] }
  0x1c   : > { %s244_s15 = scalar_lea.vmem [#allocation2], %s949_s10  ;;  %p1444_p0 = pnand %p1014_p13, %p1407_p4 }
  0x1d   : > { %s253_s16 = sshll.u32 %s244_s15, 4  ;;  %p953_p1 = scmp.ge.s32.totalorder %s1321_s23, 1  ;;  %s254_s16 = int_to_ptr.vmem [resolvable:$true] %s253_s16 }
  0x1e   : > { %s241_s27 = scalar_lea.sflag [#allocation3], %s1435_s9  ;;  %p1097_p2 = pneg %p1444_p0 }
  0x1f   : > { %s1108_s29 = scalar_lea.vmem %s254_s16, 256  ;;  %s1323_s10 = smov [#allocation2]  }
  0x20   : > { %p1109_p3 = scmp.ne.s32.totalorder %s254_s16, %s1108_s29 }
  0x21   : > { %s252_s14 = scalar_lea.hbm %s1856_s0, %s977_s11  ;;  %s1113_s11 = sshll.u32 %s1323_s10, 4  ;;  %s1114_s11 = int_to_ptr.vmem [resolvable:$false] %s1113_s11 }
  0x22   : > { %p1111_p5 = pnand %p1109_p3, %p1097_p2  ;;  %s1115_s28 = scalar_lea.vmem %s1114_s11, 512 }
  0x23   : > { %p1116_p4 = scmp.lt.s32.totalorder %s254_s16, %s1114_s11  ;;  %p1117_p7 = scmp.lt.s32.totalorder %s1115_s28, %s1108_s29 }
  0x24   : > { %p1112_p6 = pneg %p1111_p5 }
  0x25   : > { %p1118_p10 = por %p1117_p7, %p1116_p4 }
  0x27   : > { %p1119_p13 = pnand %p1118_p10, %p1112_p6 }
  0x29   : > { %1122 = shalt.err (!%p1119_p13)
}
  0x2a   : > { %s1324_s12 = smov 64   ;;  %s1325_s13 = smov 4  }
  0x2b   : > { %997 = dma.hbm_to_vmem [thread:$0]  (!%p1444_p0), %s252_s14, 256, %s254_s16, %s241_s27, %s1324_s12, %s1324_s12, %s1325_s13  }
  0x2c   : > { %p280_p3 = scmp.lt.s32.totalorder %s1321_s23, 3  ;;  %s952_s15 = sshll.u32 %s1317_s22, 4 }
  0x2d   : > { %s273_s28 = scalar_lea.hbm %s1842_s1, %s952_s15  ;;  %s266_s25 = scalar_lea.vmem [#allocation5], %s1435_s9 }
  0x2e   : > { %p1461_p5 = pnand %p953_p1, %p280_p3  ;;  %s275_s0 = sshll.u32 %s266_s25, 4  ;;  %s276_s0 = int_to_ptr.vmem [resolvable:$true] %s275_s0 }
  0x2f   : > { %s264_s26 = scalar_lea.sflag [#allocation6], %s1435_s9  ;;  %s1136_s7 = scalar_lea.vmem %s276_s0, 16 }
  0x30   : > { %p1137_p6 = scmp.ne.s32.totalorder %s276_s0, %s1136_s7  ;;  %s1326_s14 = smov [#allocation5]  }
  0x31   : > { %s1141_s16 = sshll.u32 %s1326_s14, 4  ;;  %s1142_s16 = int_to_ptr.vmem [resolvable:$false] %s1141_s16 }
  0x32   : > { %p1139_p4 = pnand %p1137_p6, %p1097_p2  ;;  %s1143_s27 = scalar_lea.vmem %s1142_s16, 32 }
  0x33   : > { %p1144_p1 = scmp.lt.s32.totalorder %s276_s0, %s1142_s16  ;;  %p1145_p10 = scmp.lt.s32.totalorder %s1143_s27, %s1136_s7 }
  0x34   : > { %p1140_p7 = pneg %p1139_p4 }
  0x35   : > { %p1146_p13 = por %p1145_p10, %p1144_p1 }
  0x37   : > { %p1147_p3 = pnand %p1146_p13, %p1140_p7 }
  0x39   : > { %1150 = shalt.err (!%p1147_p3)
}
  0x3a   : > { %1000 = dma.hbm_to_vmem [thread:$0]  (!%p1444_p0), %s273_s28, 16, %s276_s0, %s264_s26  }
  0x3b   : > { %284 = sbr.rel (%p1461_p5) target bundleno = 252 (0xfc), region = 28  ;;  %s1478_s25 = sand.u32 (!%p1461_p5), 1, %s1305_s19  }
  0x3c   : > { %s954_s9 = sshll.u32 (!%p1461_p5), %s1478_s25, 4  ;;  %s287_s12 = scalar_lea.sflag (!%p1461_p5), [#allocation3], %s1478_s25 }
  0x3d   : > { %s1482_s13 = scalar_lea.vmem (!%p1461_p5), [#allocation2], %s954_s9 }
  0x40   : > { %1280 = dma.done.wait (%p1415_p8), %s287_s12, 256  }
  0x41   : > { %1282 = vsyncadd (%p1415_p8), %s287_s12, 4294967040  ;;  %s296_s0 = scalar_lea.sflag [#allocation6], %s1478_s25  ;;  %s298_s26 = scalar_lea.vmem [#allocation5], %s1478_s25 }
  0x42   : > { %1284 = dma.done.wait (%p1415_p8), %s296_s0, 16  }
  0x43   : > { %1286 = vsyncadd (%p1415_p8), %s296_s0, 4294967280  ;;  %s955_s7 = sshll.u32 %s1478_s25, 2  ;;  %v1327_v0 = vmov 0.0   ;;  %vm372_vm0 = vcmask 1043456   ;;  %v366_v1 = vld [vmem:[%s1482_s13] sm:$0xf] }
  0x44   : > { %s1495_s17 = scalar_lea.vmem [#allocation8], %s955_s7  ;;  %s1501_s15 = scalar_lea.vmem [#allocation7], %s955_s7  ;;  %v367_v2 = vld [vmem:[%s1482_s13 + $0x4] sm:$0xf]  ;;  %v368_v3 = vld [vmem:[%s1482_s13 + $0x8] sm:$0xf] }
  0x45   : > { %354 = vst [vmem:[%s1495_s17] sm:$0x1] %v1327_v0  ;;  %355 = vst [vmem:[%s1495_s17 + $0x1] sm:$0x1] %v1327_v0  ;;  %s1507_s30 = scalar_lea.vmem [#allocation10], %s955_s7  ;;  %s1513_s10 = scalar_lea.vmem [#allocation11], %s955_s7  ;;  %v373_v5 = vsel %vm372_vm0, %v366_v1, -inf }
  0x46   : > { %356 = vst [vmem:[%s1495_s17 + $0x2] sm:$0x1] %v1327_v0  ;;  %357 = vst [vmem:[%s1495_s17 + $0x3] sm:$0x1] %v1327_v0  ;;  %v369_v4 = vld [vmem:[%s1482_s13 + $0xc] sm:$0xf] }
  0x47   : > { %350 = vst [vmem:[%s1501_s15] sm:$0x1] %v1327_v0  ;;  %351 = vst [vmem:[%s1501_s15 + $0x1] sm:$0x1] %v1327_v0  ;;  %v374_v6 = vsel %vm372_vm0, %v367_v2, -inf  ;;  %v375_v7 = vsel %vm372_vm0, %v368_v3, -inf  ;;  %v376_v8 = vsel %vm372_vm0, %v369_v4, -inf }
  0x48   : > { %352 = vst [vmem:[%s1501_s15 + $0x2] sm:$0x1] %v1327_v0  ;;  %353 = vst [vmem:[%s1501_s15 + $0x3] sm:$0x1] %v1327_v0  ;;  %v377_v9 = vmax.f32 %v373_v5, %v374_v6  ;;  %v378_v10 = vmax.f32 %v375_v7, %v376_v8  ;;  %v370_v11 = vld [vmem:[%s298_s26] sm:$0x1] }
  0x49   : > { %358 = vst [vmem:[%s1507_s30] sm:$0x1] %v1327_v0  ;;  %359 = vst [vmem:[%s1507_s30 + $0x1] sm:$0x1] %v1327_v0  ;;  %v371_v12 = vunpack.c.0.s8 %v370_v11  ;;  %s651_s29 = sand.u32 1, %s1395_s24   ;;  %s1611_s11 = sshll.u32 %s1313_s21, 6 }
  0x4a   : > { %360 = vst [vmem:[%s1507_s30 + $0x2] sm:$0x1] %v1327_v0  ;;  %361 = vst [vmem:[%s1507_s30 + $0x3] sm:$0x1] %v1327_v0  ;;  %v379_v13 = vmax.f32 %v377_v9, %v378_v10  ;;  %s695_s28 = sshll.u32 %s1495_s17, 4  ;;  %s713_s14 = sshll.u32 %s1507_s30, 4  ;;  %s1625_s28 = int_to_ptr.vmem [resolvable:$true] %s695_s28  ;;  %s1640_s14 = int_to_ptr.vmem [resolvable:$true] %s713_s14 }
  0x4b   : > { %362 = vst [vmem:[%s1513_s10] sm:$0x1] %v1327_v0  ;;  %363 = vst [vmem:[%s1513_s10 + $0x1] sm:$0x1] %v1327_v0  ;;  %vm410_vm1 = vcmp.eq.s32.totalorder %v371_v12, 0  ;;  %vm411_vm2 = vcmp.eq.s32.totalorder %v371_v12, 1  ;;  %vm412_vm3 = vcmp.eq.s32.totalorder %v371_v12, 2  ;;  %s1623_s27 = scalar_lea.hbm %s1844_s3, %s1611_s11  ;;  %s1638_s13 = scalar_lea.hbm %s1845_s4, %s1611_s11 }
  0x4c   : > { %364 = vst [vmem:[%s1513_s10 + $0x2] sm:$0x1] %v1327_v0  ;;  %365 = vst [vmem:[%s1513_s10 + $0x3] sm:$0x1] %v1327_v0  ;;  %vm413_vm4 = vcmp.eq.s32.totalorder %v371_v12, 3  ;;  %v380_v14 = vsub.f32 %v366_v1, %v379_v13  ;;  %v381_v15 = vsub.f32 %v367_v2, %v379_v13  ;;  %v382_v16 = vsub.f32 %v368_v3, %v379_v13  ;;  %s1657_s0 = scalar_lea.sflag [#allocation9], %s651_s29 }
  0x4d   : > { %v383_v17 = vsub.f32 %v369_v4, %v379_v13  ;;  %v1529_v18 = vsel %vm410_vm1, 1.0, %v1327_v0  ;;  %v1531_v19 = vsel %vm411_vm2, 1.0, %v1327_v0  ;;  %v1533_v20 = vsel %vm412_vm3, 1.0, %v1327_v0  ;;  %s1151_s26 = scalar_lea.vmem %s1625_s28, 64  ;;  %s1328_s7 = smov [#allocation8]  }
  0x4e   : > { %v1535_v21 = vsel %vm413_vm4, 1.0, %v1327_v0  ;;  %v384_v22 = vmul.f32 1.442695, %v380_v14  ;;  %v386_v23 = vmul.f32 1.442695, %v381_v15  ;;  %v514_v26 = vsel %vm372_vm0, %v1529_v18, 0.0  ;;  %p1152_p8 = scmp.ne.s32.totalorder %s1625_s28, %s1151_s26 }
  0x4f   : > { %v388_v24 = vmul.f32 1.442695, %v382_v16  ;;  %v390_v25 = vmul.f32 1.442695, %v383_v17  ;;  %v521_v27 = vsel %vm372_vm0, %v1531_v19, 0.0  ;;  %v528_v28 = vsel %vm372_vm0, %v1533_v20, 0.0 }
  0x50   : > { %1069 = vpow2.f32 %v384_v22  ;;  %v515_v29 = vrot.slane %v514_v26, 4  ;;  %v522_v30 = vrot.slane %v521_v27, 4  ;;  %v529_v31 = vrot.slane %v528_v28, 4  ;;  %v510_v48 = vld [vmem:[%s1507_s30] sm:$0x1]  ;;  %p1153_p0 = pnand %p1152_p8, %p1419_p9 }
  0x51   : > { %1071 = vpow2.f32 %v386_v23  ;;  %v535_v32 = vsel %vm372_vm0, %v1535_v21, 0.0  ;;  %v511_v49 = vld [vmem:[%s1507_s30 + $0x1] sm:$0x1]  ;;  %v512_v50 = vld [vmem:[%s1507_s30 + $0x2] sm:$0x1] }
  0x52   : > { %1073 = vpow2.f32 %v388_v24  ;;  %v516_v33 = vadd.f32 %v515_v29, %v514_v26  ;;  %v523_v34 = vadd.f32 %v522_v30, %v521_v27  ;;  %v530_v35 = vadd.f32 %v529_v31, %v528_v28  ;;  %v513_v59 = vld [vmem:[%s1507_s30 + $0x3] sm:$0x1]  ;;  %p1154_p2 = pneg %p1153_p0 }
  0x53   : > { %1075 = vpow2.f32 %v390_v25  ;;  %v536_v36 = vrot.slane %v535_v32, 4 }
  0x54   : > { %v517_v37 = vrot.slane %v516_v33, 2  ;;  %v524_v38 = vrot.slane %v523_v34, 2  ;;  %v531_v39 = vrot.slane %v530_v35, 2 }
  0x55   : > { %v537_v40 = vadd.f32 %v536_v36, %v535_v32 }
  0x56   : > { %v518_v41 = vadd.f32 %v517_v37, %v516_v33  ;;  %v525_v42 = vadd.f32 %v524_v38, %v523_v34  ;;  %v532_v43 = vadd.f32 %v531_v39, %v530_v35 }
  0x57   : > { %v538_v44 = vrot.slane %v537_v40, 2 }
  0x58   : > { %v519_v45 = vrot.slane %v518_v41, 1  ;;  %v526_v46 = vrot.slane %v525_v42, 1  ;;  %v533_v47 = vrot.slane %v532_v43, 1 }
  0x59   : > { %v539_v51 = vadd.f32 %v538_v44, %v537_v40 }
  0x5a   : > { %v520_v52 = vadd.f32 %v519_v45, %v518_v41  ;;  %v527_v53 = vadd.f32 %v526_v46, %v525_v42  ;;  %v534_v54 = vadd.f32 %v533_v47, %v532_v43 }
  0x5b   : > { %v540_v55 = vrot.slane %v539_v51, 1 }
  0x5c   : > { %v542_v56 = vadd.f32 %v520_v52, %v510_v48  ;;  %v543_v57 = vadd.f32 %v527_v53, %v511_v49  ;;  %v544_v58 = vadd.f32 %v534_v54, %v512_v50 }
  0x5d   : > { %v1070_v60 = vpop.eup %1069  ;;  %v541_v61 = vadd.f32 %v540_v55, %v539_v51 }
  0x5e   : > { %v1072_v62 = vpop.eup %1071  ;;  %v392_v63 = vsel %vm372_vm0, %v1070_v60, 0.0  ;;  %546 = vst [vmem:[%s1507_s30] sm:$0x1] %v542_v56  ;;  %547 = vst [vmem:[%s1507_s30 + $0x1] sm:$0x1] %v543_v57 }
  0x5f   : > { %548 = vst [vmem:[%s1507_s30 + $0x2] sm:$0x1] %v544_v58  ;;  %v1074_v0 = vpop.eup %1073  ;;  %v393_v1 = vsel %vm372_vm0, %v1072_v62, 0.0  ;;  %v545_v2 = vadd.f32 %v541_v61, %v513_v59 }
  0x60   : > { %v1076_v3 = vpop.eup %1075  ;;  %v394_v4 = vadd.f32 %v393_v1, %v392_v63  ;;  %v395_v5 = vsel %vm372_vm0, %v1074_v0, 0.0 }
  0x61   : > { %v397_v6 = vsel %vm372_vm0, %v1076_v3, 0.0  ;;  %549 = vst [vmem:[%s1507_s30 + $0x3] sm:$0x1] %v545_v2  ;;  %v467_v2 = vld [vmem:[%s1495_s17 + $0x1] sm:$0x1] }
  0x62   : > { %v396_v7 = vadd.f32 %v395_v5, %v394_v4 }
  0x64   : > { %v398_v8 = vadd.f32 %v397_v6, %v396_v7 }
  0x66   : > { %1077 = vrcp.f32 %v398_v8 }
  0x73   : > { %v1078_v9 = vpop.eup %1077 }
  0x74   : > { %v400_v10 = vmul.f32 %v1078_v9, %v398_v8 }
  0x76   : > { %v401_v11 = vsub.f32 2.0, %v400_v10 }
  0x78   : > { %v402_v12 = vmul.f32 %v1078_v9, %v401_v11 }
  0x7a   : > { %v403_v13 = vmul.f32 %v402_v12, %v398_v8  ;;  %v468_v8 = vld [vmem:[%s1495_s17 + $0x2] sm:$0x1] }
  0x7c   : > { %v404_v14 = vsub.f32 2.0, %v403_v13 }
  0x7e   : > { %v405_v15 = vmul.f32 %v404_v14, %v402_v12  ;;  %v469_v12 = vld [vmem:[%s1495_s17 + $0x3] sm:$0x1] }
  0x80   : > { %v1557_v16 = vmul.f32 %v1070_v60, %v405_v15  ;;  %v1559_v17 = vmul.f32 %v1072_v62, %v405_v15  ;;  %v1561_v22 = vmul.f32 %v1074_v0, %v405_v15  ;;  %v1563_v23 = vmul.f32 %v1076_v3, %v405_v15  ;;  %v466_v62 = vld [vmem:[%s1495_s17] sm:$0x1] }
  0x82   : > { %v470_v24 = vmul.f32 %v1557_v16, %v1557_v16  ;;  %v554_v25 = vsub.f32 0.0, %v1557_v16  ;;  %v471_v26 = vmul.f32 %v1559_v17, %v1559_v17  ;;  %v555_v27 = vsub.f32 0.0, %v1559_v17 }
  0x83   : > { %v472_v28 = vmul.f32 %v1561_v22, %v1561_v22  ;;  %v556_v29 = vsub.f32 0.0, %v1561_v22  ;;  %v473_v30 = vmul.f32 %v1563_v23, %v1563_v23  ;;  %v557_v31 = vsub.f32 0.0, %v1563_v23 }
  0x84   : > { %v474_v32 = vsel %vm372_vm0, %v470_v24, 0.0  ;;  %v558_v33 = vmul.f32 1.442695, %v554_v25  ;;  %v481_v34 = vsel %vm372_vm0, %v471_v26, 0.0  ;;  %v560_v35 = vmul.f32 1.442695, %v555_v27 }
  0x85   : > { %v475_v36 = vrot.slane %v474_v32, 4  ;;  %v482_v37 = vrot.slane %v481_v34, 4  ;;  %v488_v38 = vsel %vm372_vm0, %v472_v28, 0.0  ;;  %v562_v39 = vmul.f32 1.442695, %v556_v29 }
  0x86   : > { %1079 = vpow2.f32 %v558_v33  ;;  %v489_v40 = vrot.slane %v488_v38, 4  ;;  %v495_v41 = vsel %vm372_vm0, %v473_v30, 0.0  ;;  %v564_v42 = vmul.f32 1.442695, %v557_v31 }
  0x87   : > { %v476_v43 = vadd.f32 %v475_v36, %v474_v32  ;;  %v483_v44 = vadd.f32 %v482_v37, %v481_v34  ;;  %1081 = vpow2.f32 %v560_v35  ;;  %v496_v45 = vrot.slane %v495_v41, 4  ;;  %v426_v36 = vld [vmem:[%s1501_s15] sm:$0x1] }
  0x88   : > { %v490_v46 = vadd.f32 %v489_v40, %v488_v38  ;;  %1083 = vpow2.f32 %v562_v39  ;;  %v1583_v47 = vmul.f32 %v1529_v18, %v1557_v16  ;;  %v1587_v48 = vmul.f32 %v1531_v19, %v1559_v17 }
  0x89   : > { %v477_v49 = vrot.slane %v476_v43, 2  ;;  %v484_v50 = vrot.slane %v483_v44, 2  ;;  %v497_v51 = vadd.f32 %v496_v45, %v495_v41  ;;  %1085 = vpow2.f32 %v564_v42 }
  0x8a   : > { %v491_v52 = vrot.slane %v490_v46, 2  ;;  %v430_v53 = vsel %vm372_vm0, %v1583_v47, 0.0  ;;  %v437_v54 = vsel %vm372_vm0, %v1587_v48, 0.0  ;;  %v1595_v18 = vmul.f32 %v1533_v20, %v1561_v22 }
  0x8b   : > { %v478_v55 = vadd.f32 %v477_v49, %v476_v43  ;;  %v485_v19 = vadd.f32 %v484_v50, %v483_v44  ;;  %v498_v56 = vrot.slane %v497_v51, 2  ;;  %v431_v57 = vrot.slane %v430_v53, 4  ;;  %v427_v43 = vld [vmem:[%s1501_s15 + $0x1] sm:$0x1]  ;;  %v1647_v44 = vld [vmem:[%s1501_s15 + $0x2] sm:$0x1] }
  0x8c   : > { %v492_v58 = vadd.f32 %v491_v52, %v490_v46  ;;  %v438_v59 = vrot.slane %v437_v54, 4  ;;  %v444_v60 = vsel %vm372_vm0, %v1595_v18, 0.0  ;;  %v1601_v61 = vmul.f32 %v1535_v21, %v1563_v23 }
  0x8d   : > { %v479_v63 = vrot.slane %v478_v55, 1  ;;  %v486_v20 = vrot.slane %v485_v19, 1  ;;  %v499_v0 = vadd.f32 %v498_v56, %v497_v51  ;;  %v432_v1 = vadd.f32 %v431_v57, %v430_v53 }
  0x8e   : > { %v493_v3 = vrot.slane %v492_v58, 1  ;;  %v439_v4 = vadd.f32 %v438_v59, %v437_v54  ;;  %v445_v5 = vrot.slane %v444_v60, 4  ;;  %v451_v6 = vsel %vm372_vm0, %v1601_v61, 0.0 }
  0x8f   : > { %v480_v7 = vadd.f32 %v479_v63, %v478_v55  ;;  %v487_v21 = vadd.f32 %v486_v20, %v485_v19  ;;  %v500_v9 = vrot.slane %v499_v0, 1  ;;  %v433_v10 = vrot.slane %v432_v1, 2 }
  0x90   : > { %v494_v11 = vadd.f32 %v493_v3, %v492_v58  ;;  %v440_v13 = vrot.slane %v439_v4, 2  ;;  %v446_v14 = vadd.f32 %v445_v5, %v444_v60  ;;  %v452_v15 = vrot.slane %v451_v6, 4 }
  0x91   : > { %v502_v24 = vadd.f32 %v480_v7, %v466_v62  ;;  %v503_v25 = vadd.f32 %v487_v21, %v467_v2  ;;  %v501_v26 = vadd.f32 %v500_v9, %v499_v0  ;;  %v434_v27 = vadd.f32 %v433_v10, %v432_v1 }
  0x92   : > { %v504_v28 = vadd.f32 %v494_v11, %v468_v8  ;;  %v441_v29 = vadd.f32 %v440_v13, %v439_v4  ;;  %v447_v30 = vrot.slane %v446_v14, 2  ;;  %v453_v31 = vadd.f32 %v452_v15, %v451_v6 }
  0x93   : > { %v1615_v32 = vpop.eup %1079  ;;  %506 = vst [vmem:[%s1495_s17] sm:$0x1] %v502_v24  ;;  %507 = vst [vmem:[%s1495_s17 + $0x1] sm:$0x1] %v503_v25  ;;  %v505_v33 = vadd.f32 %v501_v26, %v469_v12  ;;  %v435_v34 = vrot.slane %v434_v27, 1 }
  0x94   : > { %v1627_v35 = vpop.eup %1081  ;;  %508 = vst [vmem:[%s1495_s17 + $0x2] sm:$0x1] %v504_v28  ;;  %v442_v37 = vrot.slane %v441_v29, 1  ;;  %v1631_v38 = vadd.f32 %v447_v30, %v446_v14  ;;  %v454_v39 = vrot.slane %v453_v31, 2  ;;  %v566_v40 = vadd.f32 1.0, %v1615_v32 }
  0x95   : > { %v1642_v41 = vpop.eup %1083  ;;  %509 = vst [vmem:[%s1495_s17 + $0x3] sm:$0x1] %v505_v33  ;;  %v436_v42 = vadd.f32 %v435_v34, %v434_v27  ;;  %v575_v45 = vadd.f32 1.0, %v1627_v35  ;;  %s1155_s17 = sshll.u32 %s1328_s7, 4  ;;  %s1156_s17 = int_to_ptr.vmem [resolvable:$false] %s1155_s17 }
  0x96   : > { %v1650_v46 = vpop.eup %1085  ;;  %v443_v49 = vadd.f32 %v442_v37, %v441_v29  ;;  %v449_v50 = vrot.slane %v1631_v38, 1  ;;  %v1653_v51 = vadd.f32 %v454_v39, %v453_v31  ;;  %1087 = vlog2.f32 %v566_v40  ;;  %s1157_s30 = scalar_lea.vmem %s1156_s17, 128  ;;  %p1158_p5 = scmp.lt.s32.totalorder %s1625_s28, %s1156_s17 }
  0x97   : > { %p1159_p6 = scmp.lt.s32.totalorder %s1157_s30, %s1151_s26 }
  0x99   : > { %p1160_p4 = por %p1159_p6, %p1158_p5 }
  0x9b   : > { %p1161_p7 = pnand %p1160_p4, %p1154_p2 }
  0x9d   : > { %1164 = shalt.err (!%p1161_p7)
}
  0x9e   : > { %s1165_s24 = scalar_lea.hbm %s1623_s27, 64  ;;  %s1169_s16 = scalar_lea.hbm %s1844_s3, 128 }
  0x9f   : > { %p1166_p1 = scmp.ne.s32.totalorder %s1623_s27, %s1165_s24  ;;  %p1170_p3 = scmp.lt.s32.totalorder %s1623_s27, %s1844_s3 }
  0xa0   : > { %p1171_p8 = scmp.lt.s32.totalorder %s1169_s16, %s1165_s24 }
  0xa1   : > { %p1167_p10 = pnand %p1166_p1, %p1419_p9 }
  0xa2   : > { %p1172_p0 = por %p1171_p8, %p1170_p3 }
  0xa3   : > { %p1168_p13 = pneg %p1167_p10 }
  0xa5   : > { %p1173_p2 = pnand %p1172_p0, %p1168_p13 }
  0xa7   : > { %1176 = shalt.err (!%p1173_p2)
}
  0xa8   : > { %s1329_s26 = smov 16   ;;  %s1330_s7 = smov 1   ;;  %v458_v52 = vadd.f32 %v436_v42, %v426_v36  ;;  %1089 = vlog2.f32 %v575_v45 }
  0xa9   : > { %987 = dma.vmem_to_hbm [thread:$0]  (%p1419_p9), %s1625_s28, 64, %s1623_s27, %s1657_s0, %s1329_s26, %s1329_s26, %s1330_s7  }
  0xaa   : > { %s1177_s17 = scalar_lea.vmem %s1640_s14, 64  ;;  %s1331_s30 = smov [#allocation10]  }
  0xab   : > { %p1178_p5 = scmp.ne.s32.totalorder %s1640_s14, %s1177_s17  ;;  %s1181_s24 = sshll.u32 %s1331_s30, 4  ;;  %s1182_s24 = int_to_ptr.vmem [resolvable:$false] %s1181_s24 }
  0xac   : > { %s1183_s29 = scalar_lea.vmem %s1182_s24, 128  ;;  %p1184_p7 = scmp.lt.s32.totalorder %s1640_s14, %s1182_s24 }
  0xad   : > { %p1179_p6 = pnand %p1178_p5, %p1419_p9  ;;  %p1185_p1 = scmp.lt.s32.totalorder %s1183_s29, %s1177_s17 }
  0xaf   : > { %p1180_p4 = pneg %p1179_p6  ;;  %p1186_p10 = por %p1185_p1, %p1184_p7 }
  0xb1   : > { %p1187_p13 = pnand %p1186_p10, %p1180_p4 }
  0xb3   : > { %1190 = shalt.err (!%p1187_p13)
}
  0xb4   : > { %s1191_s28 = scalar_lea.hbm %s1638_s13, 64  ;;  %s1195_s16 = scalar_lea.hbm %s1845_s4, 128 }
  0xb5   : > { %p1192_p3 = scmp.ne.s32.totalorder %s1638_s13, %s1191_s28  ;;  %p1196_p2 = scmp.lt.s32.totalorder %s1638_s13, %s1845_s4 }
  0xb6   : > { %p1197_p5 = scmp.lt.s32.totalorder %s1195_s16, %s1191_s28 }
  0xb7   : > { %p1193_p8 = pnand %p1192_p3, %p1419_p9 }
  0xb8   : > { %p1198_p6 = por %p1197_p5, %p1196_p2 }
  0xb9   : > { %p1194_p0 = pneg %p1193_p8 }
  0xbb   : > { %p1199_p4 = pnand %p1198_p6, %p1194_p0 }
  0xbd   : > { %1202 = shalt.err (!%p1199_p4)
}
  0xbe   : > { %988 = dma.vmem_to_hbm [thread:$0]  (%p1419_p9), %s1640_s14, 64, %s1638_s13, %s1657_s0, %s1329_s26, %s1329_s26, %s1330_s7   ;;  %v459_v53 = vadd.f32 %v443_v49, %v427_v43  ;;  %v450_v54 = vadd.f32 %v449_v50, %v1631_v38  ;;  %v456_v55 = vrot.slane %v1653_v51, 1  ;;  %v584_v56 = vadd.f32 1.0, %v1642_v41 }
  0xbf   : > { %462 = vst [vmem:[%s1501_s15] sm:$0x1] %v458_v52  ;;  %v429_v19 = vld [vmem:[%s1501_s15 + $0x3] sm:$0x1]  ;;  %s677_s17 = sshll.u32 %s1501_s15, 4  ;;  %v569_v59 = vmul.f32 -0.5, %v1615_v32  ;;  %v578_v60 = vmul.f32 -0.5, %v1627_v35  ;;  %s1724_s0 = scalar_lea.hbm %s1843_s2, %s1611_s11  ;;  %s1726_s17 = int_to_ptr.vmem [resolvable:$true] %s677_s17 }
  0xc0   : > { %463 = vst [vmem:[%s1501_s15 + $0x1] sm:$0x1] %v459_v53  ;;  %v460_v57 = vadd.f32 %v450_v54, %v1647_v44  ;;  %v457_v58 = vadd.f32 %v456_v55, %v1653_v51  ;;  %1091 = vlog2.f32 %v584_v56  ;;  %v593_v63 = vadd.f32 1.0, %v1650_v46  ;;  %s647_s30 = scalar_lea.sflag [#allocation4], %s1478_s25  ;;  %s1203_s24 = scalar_lea.vmem %s1726_s17, 64 }
  0xc1   : > { %v570_v20 = vadd.f32 1.0, %v569_v59  ;;  %v572_v0 = vand.u32 2147483647, %v1615_v32  ;;  %v579_v1 = vadd.f32 1.0, %v578_v60  ;;  %v587_v2 = vmul.f32 -0.5, %v1642_v41  ;;  %p1204_p7 = scmp.ne.s32.totalorder %s1726_s17, %s1203_s24  ;;  %s1332_s29 = smov [#allocation7]  }
  0xc2   : > { %464 = vst [vmem:[%s1501_s15 + $0x2] sm:$0x1] %v460_v57  ;;  %v461_v62 = vadd.f32 %v457_v58, %v429_v19  ;;  %1093 = vlog2.f32 %v593_v63  ;;  %s1207_s28 = sshll.u32 %s1332_s29, 4  ;;  %s1208_s28 = int_to_ptr.vmem [resolvable:$false] %s1207_s28 }
  0xc3   : > { %p1205_p1 = pnand %p1204_p7, %p1419_p9  ;;  %s1209_s27 = scalar_lea.vmem %s1208_s28, 128 }
  0xc4   : > { %465 = vst [vmem:[%s1501_s15 + $0x3] sm:$0x1] %v461_v62  ;;  %p1210_p13 = scmp.lt.s32.totalorder %s1726_s17, %s1208_s28  ;;  %p1211_p3 = scmp.lt.s32.totalorder %s1209_s27, %s1203_s24 }
  0xc5   : > { %p1206_p10 = pneg %p1205_p1 }
  0xc6   : > { %p1212_p8 = por %p1211_p3, %p1210_p13 }
  0xc8   : > { %p1213_p0 = pnand %p1212_p8, %p1206_p10 }
  0xca   : > { %1216 = shalt.err (!%p1213_p0)
}
  0xcb   : > { %s1217_s15 = scalar_lea.hbm %s1724_s0, 64  ;;  %s1221_s9 = scalar_lea.hbm %s1843_s2, 128 }
  0xcc   : > { %p1218_p2 = scmp.ne.s32.totalorder %s1724_s0, %s1217_s15  ;;  %p1222_p4 = scmp.lt.s32.totalorder %s1724_s0, %s1843_s2 }
  0xcd   : > { %p1223_p7 = scmp.lt.s32.totalorder %s1221_s9, %s1217_s15 }
  0xce   : > { %p1219_p5 = pnand %p1218_p2, %p1419_p9 }
  0xcf   : > { %p1224_p1 = por %p1223_p7, %p1222_p4 }
  0xd0   : > { %p1220_p6 = pneg %p1219_p5 }
  0xd2   : > { %p1225_p10 = pnand %p1224_p1, %p1220_p6 }
  0xd4   : > { %1228 = shalt.err (!%p1225_p10)
}
  0xd5   : > { %986 = dma.vmem_to_hbm [thread:$0]  (%p1419_p9), %s1726_s17, 64, %s1724_s0, %s647_s30, %s1329_s26, %s1329_s26, %s1330_s7   ;;  %v581_v3 = vand.u32 2147483647, %v1627_v35  ;;  %v571_v4 = vmul.f32 %v1615_v32, %v570_v20  ;;  %v596_v5 = vmul.f32 -0.5, %v1650_v46  ;;  %v1088_v6 = vpop.eup %1087  ;;  %v550_v7 = vsub.f32 %v1557_v16, %v1583_v47 }
  0xd6   : > { %vm573_vm5 = vcmp.lt.f32.partialorder %v572_v0, 0.0004427343  ;;  %v580_v21 = vmul.f32 %v1627_v35, %v579_v1  ;;  %v588_v8 = vadd.f32 1.0, %v587_v2  ;;  %v1090_v9 = vpop.eup %1089  ;;  %v568_v10 = vmul.f32 0.6931472, %v1088_v6  ;;  %s731_s17 = sshll.u32 %s1513_s10, 4  ;;  %s1787_s30 = scalar_lea.hbm %s1846_s5, %s1611_s11  ;;  %s1789_s17 = int_to_ptr.vmem [resolvable:$true] %s731_s17 }
  0xd7   : > { %v551_v11 = vsub.f32 %v1559_v17, %v1587_v48  ;;  %vm582_vm6 = vcmp.lt.f32.partialorder %v581_v3, 0.0004427343  ;;  %v590_v12 = vand.u32 2147483647, %v1642_v41  ;;  %v577_v13 = vmul.f32 0.6931472, %v1090_v9  ;;  %v1092_v47 = vpop.eup %1091 }
  0xd8   : > { %v574_v14 = vsel %vm573_vm5, %v571_v4, %v568_v10  ;;  %v597_v15 = vadd.f32 1.0, %v596_v5  ;;  %v589_v26 = vmul.f32 %v1642_v41, %v588_v8  ;;  %v599_v16 = vand.u32 2147483647, %v1650_v46  ;;  %v1094_v32 = vpop.eup %1093  ;;  %v606_v50 = vld [vmem:[%s1513_s10] sm:$0x1]  ;;  %s662_s24 = scalar_lea.sflag [#allocation12], %s1478_s25 }
  0xd9   : > { %v602_v24 = vadd.f32 %v574_v14, %v550_v7  ;;  %v583_v25 = vsel %vm582_vm6, %v580_v21, %v577_v13  ;;  %v552_v28 = vsub.f32 %v1561_v22, %v1595_v18  ;;  %vm591_vm7 = vcmp.lt.f32.partialorder %v590_v12, 0.0004427343  ;;  %v607_v54 = vld [vmem:[%s1513_s10 + $0x1] sm:$0x1]  ;;  %v608_v62 = vld [vmem:[%s1513_s10 + $0x2] sm:$0x1] }
  0xda   : > { %v603_v27 = vadd.f32 %v583_v25, %v551_v11  ;;  %v586_v48 = vmul.f32 0.6931472, %v1092_v47  ;;  %v598_v31 = vmul.f32 %v1650_v46, %v597_v15  ;;  %v553_v35 = vsub.f32 %v1563_v23, %v1601_v61  ;;  %v609_v2 = vld [vmem:[%s1513_s10 + $0x3] sm:$0x1]  ;;  %s1229_s29 = scalar_lea.vmem %s1789_s17, 64  ;;  %s1333_s28 = smov [#allocation11]  }
  0xdb   : > { %v610_v17 = vsel %vm372_vm0, %v602_v24, 0.0  ;;  %vm600_vm8 = vcmp.lt.f32.partialorder %v599_v16, 0.0004427343  ;;  %v595_v22 = vmul.f32 0.6931472, %v1094_v32  ;;  %p1230_p13 = scmp.ne.s32.totalorder %s1789_s17, %s1229_s29  ;;  %s1233_s27 = sshll.u32 %s1333_s28, 4  ;;  %s1234_s27 = int_to_ptr.vmem [resolvable:$false] %s1233_s27 }
  0xdc   : > { %v611_v29 = vrot.slane %v610_v17, 4  ;;  %v617_v30 = vsel %vm372_vm0, %v603_v27, 0.0  ;;  %v592_v34 = vsel %vm591_vm7, %v589_v26, %v586_v48  ;;  %s1235_s15 = scalar_lea.vmem %s1234_s27, 128  ;;  %p1236_p0 = scmp.lt.s32.totalorder %s1789_s17, %s1234_s27 }
  0xdd   : > { %v618_v33 = vrot.slane %v617_v30, 4  ;;  %v604_v37 = vadd.f32 %v592_v34, %v552_v28  ;;  %v601_v40 = vsel %vm600_vm8, %v598_v31, %v595_v22  ;;  %p1231_p3 = pnand %p1230_p13, %p1419_p9  ;;  %p1237_p2 = scmp.lt.s32.totalorder %s1235_s15, %s1229_s29 }
  0xde   : > { %v612_v36 = vadd.f32 %v611_v29, %v610_v17  ;;  %v605_v43 = vadd.f32 %v601_v40, %v553_v35 }
  0xdf   : > { %v619_v18 = vadd.f32 %v618_v33, %v617_v30  ;;  %v624_v39 = vsel %vm372_vm0, %v604_v37, 0.0  ;;  %p1232_p8 = pneg %p1231_p3  ;;  %p1238_p5 = por %p1237_p2, %p1236_p0 }
  0xe0   : > { %v613_v38 = vrot.slane %v612_v36, 2  ;;  %v625_v42 = vrot.slane %v624_v39, 4  ;;  %v631_v23 = vsel %vm372_vm0, %v605_v43, 0.0 }
  0xe1   : > { %v620_v41 = vrot.slane %v619_v18, 2  ;;  %v632_v49 = vrot.slane %v631_v23, 4  ;;  %p1239_p6 = pnand %p1238_p5, %p1232_p8 }
  0xe2   : > { %v614_v44 = vadd.f32 %v613_v38, %v612_v36  ;;  %v626_v46 = vadd.f32 %v625_v42, %v624_v39 }
  0xe3   : > { %v621_v45 = vadd.f32 %v620_v41, %v619_v18  ;;  %v633_v55 = vadd.f32 %v632_v49, %v631_v23 }
  0xe4   : > { %v615_v61 = vrot.slane %v614_v44, 1  ;;  %v627_v52 = vrot.slane %v626_v46, 2 }
  0xe5   : > { %v622_v51 = vrot.slane %v621_v45, 1  ;;  %v634_v58 = vrot.slane %v633_v55, 2 }
  0xe6   : > { %v616_v53 = vadd.f32 %v615_v61, %v614_v44  ;;  %v628_v56 = vadd.f32 %v627_v52, %v626_v46 }
  0xe7   : > { %v623_v19 = vadd.f32 %v622_v51, %v621_v45  ;;  %v635_v63 = vadd.f32 %v634_v58, %v633_v55 }
  0xe8   : > { %v638_v57 = vadd.f32 %v616_v53, %v606_v50  ;;  %v629_v60 = vrot.slane %v628_v56, 1 }
  0xe9   : > { %v639_v59 = vadd.f32 %v623_v19, %v607_v54  ;;  %v636_v0 = vrot.slane %v635_v63, 1 }
  0xea   : > { %642 = vst [vmem:[%s1513_s10] sm:$0x1] %v638_v57  ;;  %v630_v20 = vadd.f32 %v629_v60, %v628_v56 }
  0xeb   : > { %643 = vst [vmem:[%s1513_s10 + $0x1] sm:$0x1] %v639_v59  ;;  %v637_v3 = vadd.f32 %v636_v0, %v635_v63 }
  0xec   : > { %v640_v1 = vadd.f32 %v630_v20, %v608_v62 }
  0xed   : > { %v641_v4 = vadd.f32 %v637_v3, %v609_v2 }
  0xee   : > { %644 = vst [vmem:[%s1513_s10 + $0x2] sm:$0x1] %v640_v1 }
  0xef   : > { %645 = vst [vmem:[%s1513_s10 + $0x3] sm:$0x1] %v641_v4 }
  0xf0   : > { %1242 = shalt.err (!%p1239_p6)
}
  0xf1   : > { %s1243_s10 = scalar_lea.hbm %s1787_s30, 64  ;;  %s1247_s21 = scalar_lea.hbm %s1846_s5, 128 }
  0xf2   : > { %p1244_p4 = scmp.ne.s32.totalorder %s1787_s30, %s1243_s10  ;;  %p1248_p10 = scmp.lt.s32.totalorder %s1787_s30, %s1846_s5 }
  0xf3   : > { %p1249_p13 = scmp.lt.s32.totalorder %s1247_s21, %s1243_s10 }
  0xf4   : > { %p1245_p7 = pnand %p1244_p4, %p1419_p9 }
  0xf5   : > { %p1250_p3 = por %p1249_p13, %p1248_p10 }
  0xf6   : > { %p1246_p1 = pneg %p1245_p7 }
  0xf8   : > { %p1251_p8 = pnand %p1250_p3, %p1246_p1 }
  0xfa   : > { %1254 = shalt.err (!%p1251_p8)
}
  0xfb   : > { %989 = dma.vmem_to_hbm [thread:$0]  (%p1419_p9), %s1789_s17, 64, %s1787_s30, %s662_s24, %s1329_s26, %s1329_s26, %s1330_s7  }
  0xfc PF: > { %s746_s12 = sand.u32 1, %s1301_s18   ;;  %p1002_p0 = pnand %p948_p12, %p1428_p11 }
  0xfd   : > { %s747_s14 = scalar_lea.sflag [#allocation4], %s746_s12 }
  0xfe   : > { %p1003_p2 = pneg %p1002_p0 }
 0x100   : > { %1288 = dma.done.wait (%p1003_p2), %s747_s14, 64  }
 0x101   : > { %1290 = vsyncadd (%p1003_p2), %s747_s14, 4294967232  ;;  %s1859_s6 = sadd.s32 4294967294, %s1321_s23  }
 0x102   : > { %s755_s13 = sand.u32 1, %s1859_s6  }
 0x103   : > { %s756_s0 = scalar_lea.sflag [#allocation9], %s755_s13 }
 0x104   : > { %1292 = dma.done.wait (%p1003_p2), %s756_s0, 128  }
 0x105   : > { %1294 = vsyncadd (%p1003_p2), %s756_s0, 4294967168  ;;  %s774_s29 = scalar_lea.sflag [#allocation12], %s746_s12 }
 0x106   : > { %1296 = dma.done.wait (%p1003_p2), %s774_s29, 64  }
 0x107   : > { %1298 = vsyncadd (%p1003_p2), %s774_s29, 4294967232  ;;  %s31_s23 = sadd.s32 1, %s1321_s23   ;;  %s1860_s8 = sld [smem:[#allocation19_spill]] }
 0x108   : > { %p28_p9 = scmp.ge.s32.totalorder %s31_s23, 4   ;;  %s1861_s26 = sld [smem:[#allocation18_spill]] }
 0x109   : > { %s1862_s18 = smov %s1305_s19  ;;  %s1863_s19 = smov %s1309_s20 }
 0x10a   : > { %s1865_s21 = smov %s1317_s22  ;;  %30 = sbr.rel (!%p28_p9) target bundleno = 14 (0xe), region = 139 }
 0x10d   : > { %s1864_s20 = smov %s1860_s8 }
 0x10e   : > { %s1866_s22 = smov %s1861_s26 }
 0x10f   :  { %779 = vsyncpa [#allocation3], 1 }
 0x110   :  { %781 = vsyncpa [#allocation3 + $0x1], 1 }
 0x111   :  { %782 = vsyncpa [#allocation6], 1 }
 0x112   :  { %784 = vsyncpa [#allocation6 + $0x1], 1 }
 0x113   :  { %785 = vsyncpa [#allocation4], 1 }
 0x114   :  { %787 = vsyncpa [#allocation4 + $0x1], 1 }
 0x115   :  { %788 = vsyncpa [#allocation9], 1 }
 0x116   :  { %790 = vsyncpa [#allocation9 + $0x1], 1 }
 0x117   :  { %791 = vsyncpa [#allocation12], 1 }
 0x118   :  { %793 = vsyncpa [#allocation12 + $0x1], 1 }

</bundles_post_ra>
